<compile_context>
chip_gen: v7x
topology: tpu7x:2x2x1
jax: 0.10.0
libtpu: 0.0.40
codegen_flags: <defaults>
</compile_context>

<pallas_src>
import functools

import jax
import jax.numpy as jnp
from jax.experimental import pallas as pl
from jax.experimental.pallas import tpu as pltpu


def _label_smoothing_kernel(x_ref, tgt_ref, out_ref, *,
                            confidence, smoothing, inv_c, n):
    """One row block -> one partial-sum scalar; tail rows masked in-kernel."""
    block_rows, _ = x_ref.shape
    i = pl.program_id(0)

    x = x_ref[...].astype(jnp.float32)                          # (TN, C)

    # Static-shape row-validity mask for the ragged tail (n is a trace-time
    # constant; for interior blocks this folds to all-true).  Masking x itself
    # keeps the unspecified tail rows finite so exp/log can't produce NaNs.
    row = (jax.lax.broadcasted_iota(jnp.int32, (block_rows, 1), 0)
           + i * block_rows)                                    # (TN, 1)
    valid = row < n
    x = jnp.where(valid, x, 0.0)

    # Per-row scalars only -- never materialize full logprobs.
    m = jnp.max(x, axis=-1, keepdims=True)                      # (TN, 1)
    # TODO(synk): on v7x, doing the exp in bf16 (f32 accumulate) roughly
    # doubles EUP throughput if tolerance allows; kept f32 for v5e portability.
    s = jnp.sum(jnp.exp(x - m), axis=-1, keepdims=True)         # (TN, 1)
    lse = jnp.log(s)                                            # (TN, 1)

    # Fused weighted reduction: one cross-lane sum instead of two.
    #   loss = (confidence+smoothing)*(m+lse) - sum_j w_j * x_j
    #   w_j  = confidence + smoothing/C   at the target column
    #        = smoothing/C                elsewhere
    tgt = tgt_ref[...]                                          # (TN, 1) int32
    col = jax.lax.broadcasted_iota(jnp.int32, x.shape, 1)
    w = jnp.where(col == tgt,
                  confidence + smoothing * inv_c,
                  smoothing * inv_c)
    weighted = jnp.sum(w * x, axis=-1, keepdims=True)           # (TN, 1)

    per_row = (confidence + smoothing) * (m + lse) - weighted   # (TN, 1)
    per_row = jnp.where(valid, per_row, 0.0)

    # One scalar per grid step (independent output block -> axis stays
    # "parallel"); the final mean over num_blocks scalars happens outside.
    out_ref[...] = jnp.sum(per_row, axis=0, keepdims=True).reshape(1, 1, 1)


def _choose_block_rows(n, c, itemsize, target_block_bytes=4 << 20):
    """Rows per block from a VMEM budget (~4 MiB of *input* bytes per block)."""
    bytes_per_row = itemsize * c
    br = (target_block_bytes // bytes_per_row) // 8 * 8
    br = max(8, int(br))
    n_pad8 = -(-n // 8) * 8
    # TODO(synk): for huge C even 8 rows of f32 temporaries gets large; that
    # case needs the online-logsumexp-over-C variant noted above.
    return int(min(br, n_pad8))


def label_smoothing_loss(x, target, smoothing=0.1, block_rows=None):
    """x: (N, C) float logits; target: (N,) int class indices -> scalar loss."""
    n, c = x.shape
    confidence = 1.0 - smoothing

    if block_rows is None:
        block_rows = _choose_block_rows(n, c, x.dtype.itemsize)
        # v7x megacore: ensure >= 2 grid steps so the "parallel" axis shards
        # across both TensorCores (harmless no-op on v5e/v6e, skipped if n<=8).
        if -(-n // block_rows) < 2 and n > 8:
            half = -(-n // 2)
            block_rows = max(8, -(-half // 8) * 8)
    block_rows = int(block_rows)
    assert block_rows % 8 == 0

    num_blocks = -(-n // block_rows)

    # No padding of x: the last (partial) block is masked inside the kernel.
    tgt2d = target.astype(jnp.int32).reshape(n, 1)

    kernel = functools.partial(
        _label_smoothing_kernel,
        confidence=float(confidence),
        smoothing=float(smoothing),
        inv_c=float(1.0 / c),
        n=int(n),
    )

    per_block = pl.pallas_call(
        kernel,
        out_shape=jax.ShapeDtypeStruct((num_blocks, 1, 1), jnp.float32),
        grid_spec=pltpu.PrefetchScalarGridSpec(
            num_scalar_prefetch=0,
            grid=(num_blocks,),
            in_specs=[
                pl.BlockSpec((block_rows, c), lambda i: (i, 0)),
                pl.BlockSpec((block_rows, 1), lambda i: (i, 0)),
            ],
            out_specs=pl.BlockSpec((1, 1, 1), lambda i: (i, 0, 0)),
        ),
        compiler_params=pltpu.CompilerParams(
            dimension_semantics=("parallel",),
            vmem_limit_bytes=32 * 1024 * 1024,
        ),
    )(x, tgt2d)

    # Final mean over the batch: num_blocks scalars summed outside the kernel.
    return jnp.sum(per_block) / jnp.float32(n)


def _reference(x, target, smoothing=0.1):
    confidence = 1.0 - smoothing
    logprobs = jax.nn.log_softmax(x.astype(jnp.float32), axis=-1)
    nll = -jnp.take_along_axis(logprobs, target[:, None], axis=-1)[:, 0]
    smooth = -jnp.mean(logprobs, axis=-1)
    return jnp.mean(confidence * nll + smoothing * smooth)


if __name__ == "__main__":
    key = jax.random.PRNGKey(0)
    kx, kt, kx2, kt2, kx3, kt3 = jax.random.split(key, 6)

    # Case 1: small, block-aligned batch (single full block).
    N, C = 8, 32
    x = jax.random.normal(kx, (N, C), dtype=jnp.float32)
    target = jax.random.randint(kt, (N,), 0, C, dtype=jnp.int32)
    loss = jax.block_until_ready(label_smoothing_loss(x, target, smoothing=0.1))
    ref = _reference(x, target, smoothing=0.1)
    assert jnp.allclose(loss, ref, atol=1e-5, rtol=1e-5), (loss, ref)

    # Case 2: ragged batch (exercises in-kernel tail masking, no padding).
    N2, C2 = 13, 32
    x2 = jax.random.normal(kx2, (N2, C2), dtype=jnp.float32)
    target2 = jax.random.randint(kt2, (N2,), 0, C2, dtype=jnp.int32)
    loss2 = jax.block_until_ready(
        label_smoothing_loss(x2, target2, smoothing=0.1))
    ref2 = _reference(x2, target2, smoothing=0.1)
    assert jnp.allclose(loss2, ref2, atol=1e-5, rtol=1e-5), (loss2, ref2)

    # Case 3: bf16 logits, C not a multiple of 128, multi-block ragged batch.
    N3, C3 = 24, 160
    x3 = jax.random.normal(kx3, (N3, C3), dtype=jnp.float32).astype(jnp.bfloat16)
    target3 = jax.random.randint(kt3, (N3,), 0, C3, dtype=jnp.int32)
    loss3 = jax.block_until_ready(
        label_smoothing_loss(x3, target3, smoothing=0.1))
    ref3 = _reference(x3, target3, smoothing=0.1)
    assert jnp.allclose(loss3, ref3, atol=1e-4, rtol=1e-4), (loss3, ref3)

    print("KERNEL_OK")
</pallas_src>

<mosaic_0001>
module attributes {stable_mosaic.version = 11 : i64} {
  func.func @_label_smoothing_kernel(%arg0: i32, %arg1: memref<8x32xf32, #tpu.memory_space<vmem>>, %arg2: memref<8x1xi32, #tpu.memory_space<vmem>>, %arg3: memref<1x1x1xf32, #tpu.memory_space<vmem>>) attributes {dimension_semantics = [#tpu.dimension_semantics<parallel>], iteration_bounds = array<i64: 1>, scalar_prefetch = 0 : i64, scratch_operands = 0 : i64, tpu.core_type = #tpu.core_type<tc>, window_params = [{transform_indices = @transform_0, window_bounds = array<i64: 8, 32>}, {transform_indices = @transform_1, window_bounds = array<i64: 8, 1>}, {transform_indices = @transform_2, window_bounds = array<i64: 1, 1, 1>}]} {
    %c0 = arith.constant 0 : index
    %c0_0 = arith.constant 0 : index
    %0 = vector.load %arg1[%c0, %c0_0] : memref<8x32xf32, #tpu.memory_space<vmem>>, vector<8x32xf32>
    %1 = tpu.iota {dimensions = array<i32: 0>} : vector<8x1xi32>
    %c8_i32 = arith.constant 8 : i32
    %2 = arith.muli %arg0, %c8_i32 : i32
    %3 = vector.broadcast %2 : i32 to vector<8x1xi32>
    %4 = arith.addi %1, %3 : vector<8x1xi32>
    %c8_i32_1 = arith.constant 8 : i32
    %5 = vector.broadcast %c8_i32_1 : i32 to vector<8x1xi32>
    %6 = arith.cmpi slt, %4, %5 : vector<8x1xi32>
    %cst = arith.constant 0.000000e+00 : f32
    %7 = vector.shape_cast %6 : vector<8x1xi1> to vector<8x1xi1>
    %8 = vector.broadcast %7 : vector<8x1xi1> to vector<8x32xi1>
    %9 = vector.broadcast %cst : f32 to vector<8x32xf32>
    %10 = arith.select %8, %0, %9 : vector<8x32xi1>, vector<8x32xf32>
    %cst_2 = arith.constant dense<0xFF800000> : vector<8xf32>
    %11 = vector.multi_reduction <maximumf>, %10, %cst_2 [1] : vector<8x32xf32> to vector<8xf32>
    %12 = vector.shape_cast %11 : vector<8xf32> to vector<8x1xf32>
    %13 = vector.broadcast %12 : vector<8x1xf32> to vector<8x32xf32>
    %14 = arith.subf %10, %13 : vector<8x32xf32>
    %15 = math.exp %14 : vector<8x32xf32>
    %cst_3 = arith.constant dense<0.000000e+00> : vector<8xf32>
    %16 = vector.multi_reduction <add>, %15, %cst_3 [1] : vector<8x32xf32> to vector<8xf32>
    %17 = vector.shape_cast %16 : vector<8xf32> to vector<8x1xf32>
    %18 = math.log %17 : vector<8x1xf32>
    %c0_4 = arith.constant 0 : index
    %c0_5 = arith.constant 0 : index
    %19 = vector.load %arg2[%c0_4, %c0_5] : memref<8x1xi32, #tpu.memory_space<vmem>>, vector<8x1xi32>
    %20 = tpu.iota {dimensions = array<i32: 1>} : vector<8x32xi32>
    %21 = vector.broadcast %19 : vector<8x1xi32> to vector<8x32xi32>
    %22 = arith.cmpi eq, %20, %21 : vector<8x32xi32>
    %cst_6 = arith.constant 0.903124988 : f32
    %cst_7 = arith.constant 3.125000e-03 : f32
    %23 = vector.broadcast %cst_6 : f32 to vector<8x32xf32>
    %24 = vector.broadcast %cst_7 : f32 to vector<8x32xf32>
    %25 = arith.select %22, %23, %24 : vector<8x32xi1>, vector<8x32xf32>
    %26 = arith.mulf %25, %10 : vector<8x32xf32>
    %cst_8 = arith.constant dense<0.000000e+00> : vector<8xf32>
    %27 = vector.multi_reduction <add>, %26, %cst_8 [1] : vector<8x32xf32> to vector<8xf32>
    %28 = vector.shape_cast %27 : vector<8xf32> to vector<8x1xf32>
    %29 = arith.addf %12, %18 : vector<8x1xf32>
    %cst_9 = arith.constant 1.000000e+00 : f32
    %30 = vector.broadcast %cst_9 : f32 to vector<8x1xf32>
    %31 = arith.mulf %30, %29 : vector<8x1xf32>
    %32 = arith.subf %31, %28 : vector<8x1xf32>
    %cst_10 = arith.constant 0.000000e+00 : f32
    %33 = vector.broadcast %cst_10 : f32 to vector<8x1xf32>
    %34 = arith.select %6, %32, %33 : vector<8x1xi1>, vector<8x1xf32>
    %cst_11 = arith.constant dense<0.000000e+00> : vector<1xf32>
    %35 = vector.multi_reduction <add>, %34, %cst_11 [0] : vector<8x1xf32> to vector<1xf32>
    %36 = vector.shape_cast %35 : vector<1xf32> to vector<1x1xf32>
    %37 = vector.shape_cast %36 : vector<1x1xf32> to vector<1x1x1xf32>
    %c0_12 = arith.constant 0 : index
    %c0_13 = arith.constant 0 : index
    %c0_14 = arith.constant 0 : index
    %38 = vector.load %arg3[%c0_12, %c0_13, %c0_14] : memref<1x1x1xf32, #tpu.memory_space<vmem>>, vector<1x1x1xf32>
    tpu.vector_store %arg3[%c0_12, %c0_13, %c0_14], %37 {strides = array<i32>} : memref<1x1x1xf32, #tpu.memory_space<vmem>>, vector<1x1x1xf32>,
    return
  }
  func.func @transform_0(%arg0: i32) -> (i32, i32) {
    %c0_i32 = arith.constant 0 : i32
    %c0_i32_0 = arith.constant 0 : i32
    return %arg0, %c0_i32 : i32, i32
  }
  func.func @transform_1(%arg0: i32) -> (i32, i32) {
    %c0_i32 = arith.constant 0 : i32
    %c0_i32_0 = arith.constant 0 : i32
    return %arg0, %c0_i32 : i32, i32
  }
  func.func @transform_2(%arg0: i32) -> (i32, i32, i32) {
    %c0_i32 = arith.constant 0 : i32
    %c0_i32_0 = arith.constant 0 : i32
    %c0_i32_1 = arith.constant 0 : i32
    return %arg0, %c0_i32, %c0_i32_0 : i32, i32, i32
  }
}

</mosaic_0001>

<bundles_post_ra>
// kernel: tpu_custom_call.1
= control target key start
LH: loop header
LB: loop body
LE: loop exit
PB: predicated region body
PF: predicated region fallthrough
CT: control target
= control target key end

     0   :  { %vm22_vm0 = vcmask 261120   ;;  %s142_s0 = inlined_call_operand.vmem [shape: f32[8,32], index: 0, kind: input, shape index: {}]   ;;  %s143_s1 = inlined_call_operand.vmem [shape: s32[8,1], index: 1, kind: input, shape index: {}]   ;;  %s144_s2 = inlined_call_operand.hbm [shape: f32[1,1,1], index: 2, kind: output, shape index: {}]  }
   0x1   :  { %v12_v0 = vld [vmem:[%s142_s0] sm:$0xff] }
   0x2   :  { %7 = vsyncpa [#allocation3], 0  ;;  %v23_v1 = vsel %vm22_vm0, %v12_v0, -inf  ;;  %v103_v2 = vmov 0   ;;  %v34_v3 = vld [vmem:[%s143_s1] sm:$0xff]  ;;  %v35_v6 = vlaneseq  ;;  %s105_s0 = smov [#allocation2]  }
   0x3   :  { %74 = vset.pattern.permute.xlu0 %v103_v2  ;;  %v104_v10 = vmov 0.003125   ;;  %s63_s1 = sshll.u32 %s105_s0, 4  ;;  %vm55_vm2 = vcmask 0   ;;  %s64_s1 = int_to_ptr.vmem [resolvable:$true] %s63_s1 }
   0x4   :  { %24 = vmax.xlane.f32.xlu0 %v23_v1  ;;  %v36_v8 = vand.u32 127, %v35_v6  ;;  %s79_s13 = scalar_lea.vmem %s64_s1, 16  ;;  %s83_s14 = scalar_lea.vmem %s64_s1, 32 }
   0x5   :  { %p80_p0 = scmp.ne.s32.totalorder %s64_s1, %s79_s13  ;;  %p84_p1 = scmp.lt.s32.totalorder %s64_s1, %s64_s1 }
   0x6   :  { %p85_p2 = scmp.lt.s32.totalorder %s83_s14, %s79_s13 }
   0x8   :  { %p86_p3 = por %p85_p2, %p84_p1 }
   0xa   :  { %p87_p4 = pnand %p86_p3, %p80_p0 }
  0x1a   :  { %38 = vperm.xlu0 %74, %v34_v3  }
  0x91   :  { %v25_v4 = vpop.xlane.xlu0 %24 }
  0x92   :  { %v26_v5 = vsub.f32 %v12_v0, %v25_v4 }
  0x94   :  { %v27_v7 = vmul.f32 1.442695, %v26_v5 }
  0x96   :  { %75 = vpow2.f32 %v27_v7 }
  0x99   :  { %v39_v9 = vpop.permute.xlu0 %38 }
  0x9a   :  { %vm40_vm1 = vcmp.eq.s32.totalorder %v36_v8, %v39_v9 }
  0x9b   :  { %v41_v11 = vsel %vm40_vm1, 0.903125, %v104_v10 }
  0x9c   :  { %v42_v12 = vmul.f32 %v41_v11, %v12_v0 }
  0x9e   :  { %v43_v15 = vsel %vm22_vm0, %v42_v12, 0.0 }
  0xa0   :  { %v76_v13 = vpop.eup %75 }
  0xa1   :  { %v29_v14 = vsel %vm22_vm0, %v76_v13, 0.0 }
  0xa2   :  { %30 = vadd.xlane.f32.xlu1 %v29_v14 }
  0xa6   :  { %44 = vadd.xlane.f32.xlu1 %v43_v15 }
 0x12f   :  { %v31_v16 = vpop.xlane.xlu1 %30 }
 0x130   :  { %77 = vlog2.f32 %v31_v16 }
 0x133   :  { %v45_v19 = vpop.xlane.xlu1 %44 }
 0x13a   :  { %v78_v17 = vpop.eup %77 }
 0x13b   :  { %v33_v18 = vmul.f32 0.6931472, %v78_v17 }
 0x13d   :  { %v46_v20 = vadd.f32 %v33_v18, %v25_v4 }
 0x13f   :  { %v47_v21 = vsub.f32 %v46_v20, %v45_v19 }
 0x141   :  { %v49_v22 = vrot.slane %v47_v21, 4 }
 0x143   :  { %v50_v23 = vadd.f32 %v49_v22, %v47_v21 }
 0x145   :  { %v51_v24 = vrot.slane %v50_v23, 2 }
 0x147   :  { %v52_v25 = vadd.f32 %v51_v24, %v50_v23 }
 0x149   :  { %v53_v26 = vrot.slane %v52_v25, 1 }
 0x14b   :  { %v54_v27 = vadd.f32 %v53_v26, %v52_v25 }
 0x14d   :  { %56 = vst.msk [vmem:[#allocation2] sm:$0x1] %vm55_vm2, %v54_v27 }
 0x14e   :  { %90 = shalt.err (!%p87_p4)
}
 0x14f   :  { %s91_s17 = scalar_lea.hbm %s144_s2, 16 }
 0x150   :  { %p92_p5 = scmp.ne.s32.totalorder %s144_s2, %s91_s17  ;;  %p95_p6 = scmp.lt.u32.totalorder %s91_s17, %s144_s2 }
 0x152   :  { %p97_p7 = pnand %p95_p6, %p92_p5 }
 0x154   :  { %100 = shalt.err (!%p97_p7)
}
 0x155   :  { %66 = dma.vmem_to_hbm [thread:$0]  %s64_s1, 16, %s144_s2, [#allocation3]  }
 0x156   :  { %101 = dma.done.wait [#allocation3], 16  }
 0x157   :  { %102 = vsyncadd [#allocation3], 4294967280 }
 0x158   :  { %70 = vsyncpa [#allocation3], 1 }

</bundles_post_ra>
